<compile_context>
chip_gen: v7x
topology: tpu7x:2x2x1
jax: 0.10.0
libtpu: 0.0.40
codegen_flags: <defaults>
</compile_context>

<pallas_src>
import functools

import jax
import jax.numpy as jnp
import numpy as np
from jax import lax
from jax.experimental import pallas as pl
from jax.experimental.pallas import tpu as pltpu

K = 5     # depthwise kernel size
PAD = 2   # SAME padding for the 5x5 depthwise conv


# ----------------------- device heuristics -----------------------
def _pick_grid_steps(n_images):
    """v7x has 2 TensorCores/chip -> split the batch across a 2-entry 'parallel'
    grid.  v5e/v6e have 1 TC, where an extra grid step is ~600 cycles of pure
    overhead, so collapse everything into a single step there."""
    try:
        kind = jax.devices()[0].device_kind.lower()
    except Exception:
        kind = ""
    if ("v7" in kind or "tpu7" in kind) and n_images % 2 == 0:
        return 2
    return 1


# ----------------------- host-side weight packing -----------------------
def _pack_layer_mats(dw, pw, scale, W):
    """Fold, per kernel row kh: the 5 kw lane-shifts of the depthwise conv, the
    SAME column masking, the pointwise 1x1 conv and the BN scale into a single
    banded-block matrix of shape (W*Cin, W*Cout).  One MXU matmul per kh."""
    Cin = dw.shape[-1]
    pwf = pw * scale[0][None, :]                             # (Cin, Cout), BN scale folded
    blocks = dw[:, :, :, None] * pwf[None, None, :, :]       # (K, K, Cin, Cout)
    wi = jnp.arange(W)
    mats = []
    for kh in range(K):
        m = jnp.zeros((W * Cin, W * pw.shape[1]), jnp.float32)
        for kw in range(K):
            # place blocks[kh, kw] at source column-block wp = w + kw - PAD;
            # out-of-range wp never appears -> SAME column padding is free.
            sel = (wi[:, None] == (wi[None, :] + kw - PAD)).astype(jnp.float32)  # (wp, w)
            m = m + jnp.kron(sel, blocks[kh, kw])
        mats.append(m)
    return jnp.stack(mats, axis=0)                           # (K, W*Cin, W*Cout)


def _pack_bias(bias, W):
    """Lane-packed BN bias: (1, W*Cout)."""
    return jnp.tile(bias[0], W).reshape(1, W * bias.shape[1])


def _row_masks(H, images_per_step):
    """SAME row-validity masks, one per kh, tiled over the images stacked in a
    grid step: (K, images_per_step*H, 1).  They also zero rows that the sublane
    roll wraps across an image boundary, keeping the batched slab correct."""
    h = jnp.arange(H)
    masks = []
    for kh in range(K):
        dh = kh - PAD
        m = ((h + dh >= 0) & (h + dh < H)).astype(jnp.float32)
        masks.append(jnp.tile(m, images_per_step))
    return jnp.stack(masks, axis=0)[:, :, None]              # (K, rows, 1)


def pack_blaze_params(params, W):
    """One-time host-side packing of BlazeBlock weights into MXU-friendly form."""
    dw1, pw1, s1, b1, dw2, pw2, s2, b2 = params
    return {
        "m1": _pack_layer_mats(dw1, pw1, s1, W), "bb1": _pack_bias(b1, W),
        "m2": _pack_layer_mats(dw2, pw2, s2, W), "bb2": _pack_bias(b2, W),
    }


# ----------------------- Pallas kernel -----------------------
def blaze_block_packed(x_packed, rm, m1, bb1, m2, bb2, *, rows, grid_steps):
    NH, WC = x_packed.shape

    def kernel(x_ref, rm_ref, m1_ref, bb1_ref, m2_ref, bb2_ref, out_ref):
        z = x_ref[...]                                   # (rows, W*C) lane-packed f32

        def dsconv(zz, m_ref, bb_ref):
            # centre row (kh == PAD): no roll, row mask all-ones -> init acc directly.
            acc = jnp.dot(zz, m_ref[PAD], preferred_element_type=jnp.float32)
            for kh in range(K):
                if kh == PAD:
                    continue
                dh = kh - PAD
                # sublane roll (XLU) + row-validity mask (VPU); the mask also
                # zeroes rows pulled across image boundaries in the stacked slab.
                zr = pltpu.roll(zz, shift=(-dh) % rows, axis=0) * rm_ref[kh]
                acc = acc + jnp.dot(zr, m_ref[kh],
                                    preferred_element_type=jnp.float32)
            return jnp.maximum(acc + bb_ref[...], 0.0)   # BN bias + ReLU

        y1 = dsconv(z, m1_ref, bb1_ref)
        y2 = dsconv(y1, m2_ref, bb2_ref)
        # identity residual (stride=1), eval-mode dropout = identity, final ReLU
        out_ref[...] = jnp.maximum(y2 + z, 0.0)          # lane-dense store

    grid_spec = pltpu.PrefetchScalarGridSpec(
        num_scalar_prefetch=0,
        grid=(grid_steps,),
        in_specs=[
            pl.BlockSpec((rows, WC),   lambda g: (g, 0)),       # input slab
            pl.BlockSpec((K, rows, 1), lambda g: (0, 0, 0)),    # row masks
            pl.BlockSpec((K, WC, WC),  lambda g: (0, 0, 0)),    # layer-1 banded mats
            pl.BlockSpec((1, WC),      lambda g: (0, 0)),       # layer-1 bias
            pl.BlockSpec((K, WC, WC),  lambda g: (0, 0, 0)),    # layer-2 banded mats
            pl.BlockSpec((1, WC),      lambda g: (0, 0)),       # layer-2 bias
        ],
        out_specs=pl.BlockSpec((rows, WC), lambda g: (g, 0)),
    )

    return pl.pallas_call(
        kernel,
        out_shape=jax.ShapeDtypeStruct((NH, WC), jnp.float32),
        grid_spec=grid_spec,
        compiler_params=pltpu.CompilerParams(
            dimension_semantics=("parallel",),           # v7x: one chunk per TC
        ),
    )(x_packed, rm, m1, bb1, m2, bb2)


# ----------------------- wrappers -----------------------
def blaze_block_nchw(x_nchw, packed, *, grid_steps):
    """PyTorch-facing wrapper: NCHW in, NCHW out.  In a chain of BlazeBlocks keep
    the packed (N*H, W*C) layout end-to-end instead of transposing per call."""
    N, C, H, W = x_nchw.shape
    WC = W * C
    assert WC == 128, "lane-dense packing requires W*C == 128"
    assert N % grid_steps == 0
    chunk = N // grid_steps
    rows = chunk * H

    x_nhwc = jnp.transpose(x_nchw, (0, 2, 3, 1))
    x_packed = x_nhwc.reshape(N * H, WC)                 # free contiguous reshape
    rm = _row_masks(H, chunk)                            # shape-only; constant-folded under jit
    y = blaze_block_packed(x_packed, rm, packed["m1"], packed["bb1"],
                           packed["m2"], packed["bb2"],
                           rows=rows, grid_steps=grid_steps)
    return jnp.transpose(y.reshape(N, H, W, C), (0, 3, 1, 2))


# ----------------------- pure-JAX reference (for verification) -----------------------
def reference_nhwc(x, params):
    dw1, pw1, s1, b1, dw2, pw2, s2, b2 = params

    def dsconv(z, dw, pw, s, b):
        C = z.shape[-1]
        w_hwio = dw[:, :, None, :]                      # (K,K,1,C), groups=C
        z = lax.conv_general_dilated(
            z, w_hwio, (1, 1), ((PAD, PAD), (PAD, PAD)),
            dimension_numbers=('NHWC', 'HWIO', 'NHWC'),
            feature_group_count=C, precision=lax.Precision.HIGHEST)
        z = jnp.einsum('nhwc,co->nhwo', z, pw, precision=lax.Precision.HIGHEST)
        z = z * s[0] + b[0]
        return jnp.maximum(z, 0.0)

    y = dsconv(x, dw1, pw1, s1, b1)
    y = dsconv(y, dw2, pw2, s2, b2)
    return jnp.maximum(y + x, 0.0)


def make_params(key, c_in, c_out):
    """Deterministic synthetic params for 2 DepthwiseSeparableConv layers."""
    ks = jax.random.split(key, 12)
    eps = 1e-5

    def bn_fold(kg, kb, km, kv, c):
        gamma = jax.random.normal(kg, (c,), jnp.float32) * 0.1 + 1.0
        beta = jax.random.normal(kb, (c,), jnp.float32) * 0.1
        mean = jax.random.normal(km, (c,), jnp.float32) * 0.1
        var = jax.random.uniform(kv, (c,), jnp.float32, 0.5, 1.5)
        scale = gamma / jnp.sqrt(var + eps)
        bias = beta - mean * scale
        return scale.reshape(1, c), bias.reshape(1, c)

    dw1 = jax.random.normal(ks[0], (K, K, c_in), jnp.float32) * 0.2
    pw1 = jax.random.normal(ks[1], (c_in, c_out), jnp.float32) * 0.2
    s1, b1 = bn_fold(ks[2], ks[3], ks[4], ks[5], c_out)
    dw2 = jax.random.normal(ks[6], (K, K, c_out), jnp.float32) * 0.2
    pw2 = jax.random.normal(ks[7], (c_out, c_out), jnp.float32) * 0.2
    s2, b2 = bn_fold(ks[8], ks[9], ks[10], ks[11], c_out)
    return (dw1, pw1, s1, b1, dw2, pw2, s2, b2)


if __name__ == "__main__":
    # BlazeBlock(in=8, out=8, stride=1, num_layers=2); W*C = 16*8 = 128 lanes.
    N, C, H, W = 2, 8, 16, 16
    key = jax.random.PRNGKey(0)
    kx, kp = jax.random.split(key)

    x_nchw = jax.random.normal(kx, (N, C, H, W), jnp.float32)   # PyTorch-style input
    params = make_params(kp, C, C)

    grid_steps = _pick_grid_steps(N)                 # 2 on v7x (one chunk per TC), else 1
    packed = pack_blaze_params(params, W)            # one-time host-side packing

    blaze_fn = jax.jit(functools.partial(blaze_block_nchw, grid_steps=grid_steps))
    out = jax.block_until_ready(blaze_fn(x_nchw, packed))

    ref = jnp.transpose(
        reference_nhwc(jnp.transpose(x_nchw, (0, 2, 3, 1)), params), (0, 3, 1, 2))
    # Slight headroom over 2e-4: all 200 products/output now accumulate on the MXU.
    np.testing.assert_allclose(np.asarray(out), np.asarray(ref), rtol=5e-4, atol=5e-4)

    print("KERNEL_OK")
</pallas_src>

<mosaic_0001>
module attributes {stable_mosaic.version = 11 : i64} {
  func.func @kernel(%arg0: i32, %arg1: memref<32x128xf32, #tpu.memory_space<vmem>>, %arg2: memref<5x32x1xf32, #tpu.memory_space<vmem>>, %arg3: memref<5x128x128xf32, #tpu.memory_space<vmem>>, %arg4: memref<1x128xf32, #tpu.memory_space<vmem>>, %arg5: memref<5x128x128xf32, #tpu.memory_space<vmem>>, %arg6: memref<1x128xf32, #tpu.memory_space<vmem>>, %arg7: memref<32x128xf32, #tpu.memory_space<vmem>>) attributes {dimension_semantics = [#tpu.dimension_semantics<parallel>], iteration_bounds = array<i64: 1>, scalar_prefetch = 0 : i64, scratch_operands = 0 : i64, tpu.core_type = #tpu.core_type<tc>, window_params = [{transform_indices = @transform_0, window_bounds = array<i64: 32, 128>}, {pipeline_mode = #tpu.pipeline_mode<synchronous>, transform_indices = @transform_1, window_bounds = array<i64: 5, 32, 1>}, {pipeline_mode = #tpu.pipeline_mode<synchronous>, transform_indices = @transform_2, window_bounds = array<i64: 5, 128, 128>}, {pipeline_mode = #tpu.pipeline_mode<synchronous>, transform_indices = @transform_3, window_bounds = array<i64: 1, 128>}, {pipeline_mode = #tpu.pipeline_mode<synchronous>, transform_indices = @transform_4, window_bounds = array<i64: 5, 128, 128>}, {pipeline_mode = #tpu.pipeline_mode<synchronous>, transform_indices = @transform_5, window_bounds = array<i64: 1, 128>}, {transform_indices = @transform_6, window_bounds = array<i64: 32, 128>}]} {
    %c0 = arith.constant 0 : index
    %c0_0 = arith.constant 0 : index
    %0 = vector.load %arg1[%c0, %c0_0] : memref<32x128xf32, #tpu.memory_space<vmem>>, vector<32x128xf32>
    %c2 = arith.constant 2 : index
    %c0_1 = arith.constant 0 : index
    %c0_2 = arith.constant 0 : index
    %1 = vector.load %arg3[%c2, %c0_1, %c0_2] : memref<5x128x128xf32, #tpu.memory_space<vmem>>, vector<1x128x128xf32>
    %2 = vector.shape_cast %1 : vector<1x128x128xf32> to vector<128x128xf32>
    %cst = arith.constant dense<0.000000e+00> : vector<32x128xf32>
    %3 = tpu.matmul %0, %2, %cst {dimension_numbers = #tpu.dot_dimension_numbers<[1], [0], [0], [1], [0, 0, 1, 1], [], []>} : vector<32x128xf32>, vector<128x128xf32>, vector<32x128xf32> -> vector<32x128xf32>
    %c2_i32 = arith.constant 2 : i32
    %4 = tpu.dynamic_rotate %0 by %c2_i32 dim 0 : vector<32x128xf32>, i32 -> vector<32x128xf32>
    %c0_3 = arith.constant 0 : index
    %c0_4 = arith.constant 0 : index
    %c0_5 = arith.constant 0 : index
    %5 = vector.load %arg2[%c0_3, %c0_4, %c0_5] : memref<5x32x1xf32, #tpu.memory_space<vmem>>, vector<1x32x1xf32>
    %6 = vector.shape_cast %5 : vector<1x32x1xf32> to vector<32x1xf32>
    %7 = vector.broadcast %6 : vector<32x1xf32> to vector<32x128xf32>
    %8 = arith.mulf %4, %7 : vector<32x128xf32>
    %c0_6 = arith.constant 0 : index
    %c0_7 = arith.constant 0 : index
    %c0_8 = arith.constant 0 : index
    %9 = vector.load %arg3[%c0_6, %c0_7, %c0_8] : memref<5x128x128xf32, #tpu.memory_space<vmem>>, vector<1x128x128xf32>
    %10 = vector.shape_cast %9 : vector<1x128x128xf32> to vector<128x128xf32>
    %cst_9 = arith.constant dense<0.000000e+00> : vector<32x128xf32>
    %11 = tpu.matmul %8, %10, %cst_9 {dimension_numbers = #tpu.dot_dimension_numbers<[1], [0], [0], [1], [0, 0, 1, 1], [], []>} : vector<32x128xf32>, vector<128x128xf32>, vector<32x128xf32> -> vector<32x128xf32>
    %12 = arith.addf %3, %11 : vector<32x128xf32>
    %c1_i32 = arith.constant 1 : i32
    %13 = tpu.dynamic_rotate %0 by %c1_i32 dim 0 : vector<32x128xf32>, i32 -> vector<32x128xf32>
    %c1 = arith.constant 1 : index
    %c0_10 = arith.constant 0 : index
    %c0_11 = arith.constant 0 : index
    %14 = vector.load %arg2[%c1, %c0_10, %c0_11] : memref<5x32x1xf32, #tpu.memory_space<vmem>>, vector<1x32x1xf32>
    %15 = vector.shape_cast %14 : vector<1x32x1xf32> to vector<32x1xf32>
    %16 = vector.broadcast %15 : vector<32x1xf32> to vector<32x128xf32>
    %17 = arith.mulf %13, %16 : vector<32x128xf32>
    %c1_12 = arith.constant 1 : index
    %c0_13 = arith.constant 0 : index
    %c0_14 = arith.constant 0 : index
    %18 = vector.load %arg3[%c1_12, %c0_13, %c0_14] : memref<5x128x128xf32, #tpu.memory_space<vmem>>, vector<1x128x128xf32>
    %19 = vector.shape_cast %18 : vector<1x128x128xf32> to vector<128x128xf32>
    %cst_15 = arith.constant dense<0.000000e+00> : vector<32x128xf32>
    %20 = tpu.matmul %17, %19, %cst_15 {dimension_numbers = #tpu.dot_dimension_numbers<[1], [0], [0], [1], [0, 0, 1, 1], [], []>} : vector<32x128xf32>, vector<128x128xf32>, vector<32x128xf32> -> vector<32x128xf32>
    %21 = arith.addf %12, %20 : vector<32x128xf32>
    %c31_i32 = arith.constant 31 : i32
    %22 = tpu.dynamic_rotate %0 by %c31_i32 dim 0 : vector<32x128xf32>, i32 -> vector<32x128xf32>
    %c3 = arith.constant 3 : index
    %c0_16 = arith.constant 0 : index
    %c0_17 = arith.constant 0 : index
    %23 = vector.load %arg2[%c3, %c0_16, %c0_17] : memref<5x32x1xf32, #tpu.memory_space<vmem>>, vector<1x32x1xf32>
    %24 = vector.shape_cast %23 : vector<1x32x1xf32> to vector<32x1xf32>
    %25 = vector.broadcast %24 : vector<32x1xf32> to vector<32x128xf32>
    %26 = arith.mulf %22, %25 : vector<32x128xf32>
    %c3_18 = arith.constant 3 : index
    %c0_19 = arith.constant 0 : index
    %c0_20 = arith.constant 0 : index
    %27 = vector.load %arg3[%c3_18, %c0_19, %c0_20] : memref<5x128x128xf32, #tpu.memory_space<vmem>>, vector<1x128x128xf32>
    %28 = vector.shape_cast %27 : vector<1x128x128xf32> to vector<128x128xf32>
    %cst_21 = arith.constant dense<0.000000e+00> : vector<32x128xf32>
    %29 = tpu.matmul %26, %28, %cst_21 {dimension_numbers = #tpu.dot_dimension_numbers<[1], [0], [0], [1], [0, 0, 1, 1], [], []>} : vector<32x128xf32>, vector<128x128xf32>, vector<32x128xf32> -> vector<32x128xf32>
    %30 = arith.addf %21, %29 : vector<32x128xf32>
    %c30_i32 = arith.constant 30 : i32
    %31 = tpu.dynamic_rotate %0 by %c30_i32 dim 0 : vector<32x128xf32>, i32 -> vector<32x128xf32>
    %c4 = arith.constant 4 : index
    %c0_22 = arith.constant 0 : index
    %c0_23 = arith.constant 0 : index
    %32 = vector.load %arg2[%c4, %c0_22, %c0_23] : memref<5x32x1xf32, #tpu.memory_space<vmem>>, vector<1x32x1xf32>
    %33 = vector.shape_cast %32 : vector<1x32x1xf32> to vector<32x1xf32>
    %34 = vector.broadcast %33 : vector<32x1xf32> to vector<32x128xf32>
    %35 = arith.mulf %31, %34 : vector<32x128xf32>
    %c4_24 = arith.constant 4 : index
    %c0_25 = arith.constant 0 : index
    %c0_26 = arith.constant 0 : index
    %36 = vector.load %arg3[%c4_24, %c0_25, %c0_26] : memref<5x128x128xf32, #tpu.memory_space<vmem>>, vector<1x128x128xf32>
    %37 = vector.shape_cast %36 : vector<1x128x128xf32> to vector<128x128xf32>
    %cst_27 = arith.constant dense<0.000000e+00> : vector<32x128xf32>
    %38 = tpu.matmul %35, %37, %cst_27 {dimension_numbers = #tpu.dot_dimension_numbers<[1], [0], [0], [1], [0, 0, 1, 1], [], []>} : vector<32x128xf32>, vector<128x128xf32>, vector<32x128xf32> -> vector<32x128xf32>
    %39 = arith.addf %30, %38 : vector<32x128xf32>
    %c0_28 = arith.constant 0 : index
    %c0_29 = arith.constant 0 : index
    %40 = vector.load %arg4[%c0_28, %c0_29] : memref<1x128xf32, #tpu.memory_space<vmem>>, vector<1x128xf32>
    %41 = vector.broadcast %40 : vector<1x128xf32> to vector<32x128xf32>
    %42 = arith.addf %39, %41 : vector<32x128xf32>
    %cst_30 = arith.constant 0.000000e+00 : f32
    %43 = vector.broadcast %cst_30 : f32 to vector<32x128xf32>
    %44 = arith.maximumf %42, %43 : vector<32x128xf32>
    %c2_31 = arith.constant 2 : index
    %c0_32 = arith.constant 0 : index
    %c0_33 = arith.constant 0 : index
    %45 = vector.load %arg5[%c2_31, %c0_32, %c0_33] : memref<5x128x128xf32, #tpu.memory_space<vmem>>, vector<1x128x128xf32>
    %46 = vector.shape_cast %45 : vector<1x128x128xf32> to vector<128x128xf32>
    %cst_34 = arith.constant dense<0.000000e+00> : vector<32x128xf32>
    %47 = tpu.matmul %44, %46, %cst_34 {dimension_numbers = #tpu.dot_dimension_numbers<[1], [0], [0], [1], [0, 0, 1, 1], [], []>} : vector<32x128xf32>, vector<128x128xf32>, vector<32x128xf32> -> vector<32x128xf32>
    %c2_i32_35 = arith.constant 2 : i32
    %48 = tpu.dynamic_rotate %44 by %c2_i32_35 dim 0 : vector<32x128xf32>, i32 -> vector<32x128xf32>
    %c0_36 = arith.constant 0 : index
    %c0_37 = arith.constant 0 : index
    %c0_38 = arith.constant 0 : index
    %49 = vector.load %arg2[%c0_36, %c0_37, %c0_38] : memref<5x32x1xf32, #tpu.memory_space<vmem>>, vector<1x32x1xf32>
    %50 = vector.shape_cast %49 : vector<1x32x1xf32> to vector<32x1xf32>
    %51 = vector.broadcast %50 : vector<32x1xf32> to vector<32x128xf32>
    %52 = arith.mulf %48, %51 : vector<32x128xf32>
    %c0_39 = arith.constant 0 : index
    %c0_40 = arith.constant 0 : index
    %c0_41 = arith.constant 0 : index
    %53 = vector.load %arg5[%c0_39, %c0_40, %c0_41] : memref<5x128x128xf32, #tpu.memory_space<vmem>>, vector<1x128x128xf32>
    %54 = vector.shape_cast %53 : vector<1x128x128xf32> to vector<128x128xf32>
    %cst_42 = arith.constant dense<0.000000e+00> : vector<32x128xf32>
    %55 = tpu.matmul %52, %54, %cst_42 {dimension_numbers = #tpu.dot_dimension_numbers<[1], [0], [0], [1], [0, 0, 1, 1], [], []>} : vector<32x128xf32>, vector<128x128xf32>, vector<32x128xf32> -> vector<32x128xf32>
    %56 = arith.addf %47, %55 : vector<32x128xf32>
    %c1_i32_43 = arith.constant 1 : i32
    %57 = tpu.dynamic_rotate %44 by %c1_i32_43 dim 0 : vector<32x128xf32>, i32 -> vector<32x128xf32>
    %c1_44 = arith.constant 1 : index
    %c0_45 = arith.constant 0 : index
    %c0_46 = arith.constant 0 : index
    %58 = vector.load %arg2[%c1_44, %c0_45, %c0_46] : memref<5x32x1xf32, #tpu.memory_space<vmem>>, vector<1x32x1xf32>
    %59 = vector.shape_cast %58 : vector<1x32x1xf32> to vector<32x1xf32>
    %60 = vector.broadcast %59 : vector<32x1xf32> to vector<32x128xf32>
    %61 = arith.mulf %57, %60 : vector<32x128xf32>
    %c1_47 = arith.constant 1 : index
    %c0_48 = arith.constant 0 : index
    %c0_49 = arith.constant 0 : index
    %62 = vector.load %arg5[%c1_47, %c0_48, %c0_49] : memref<5x128x128xf32, #tpu.memory_space<vmem>>, vector<1x128x128xf32>
    %63 = vector.shape_cast %62 : vector<1x128x128xf32> to vector<128x128xf32>
    %cst_50 = arith.constant dense<0.000000e+00> : vector<32x128xf32>
    %64 = tpu.matmul %61, %63, %cst_50 {dimension_numbers = #tpu.dot_dimension_numbers<[1], [0], [0], [1], [0, 0, 1, 1], [], []>} : vector<32x128xf32>, vector<128x128xf32>, vector<32x128xf32> -> vector<32x128xf32>
    %65 = arith.addf %56, %64 : vector<32x128xf32>
    %c31_i32_51 = arith.constant 31 : i32
    %66 = tpu.dynamic_rotate %44 by %c31_i32_51 dim 0 : vector<32x128xf32>, i32 -> vector<32x128xf32>
    %c3_52 = arith.constant 3 : index
    %c0_53 = arith.constant 0 : index
    %c0_54 = arith.constant 0 : index
    %67 = vector.load %arg2[%c3_52, %c0_53, %c0_54] : memref<5x32x1xf32, #tpu.memory_space<vmem>>, vector<1x32x1xf32>
    %68 = vector.shape_cast %67 : vector<1x32x1xf32> to vector<32x1xf32>
    %69 = vector.broadcast %68 : vector<32x1xf32> to vector<32x128xf32>
    %70 = arith.mulf %66, %69 : vector<32x128xf32>
    %c3_55 = arith.constant 3 : index
    %c0_56 = arith.constant 0 : index
    %c0_57 = arith.constant 0 : index
    %71 = vector.load %arg5[%c3_55, %c0_56, %c0_57] : memref<5x128x128xf32, #tpu.memory_space<vmem>>, vector<1x128x128xf32>
    %72 = vector.shape_cast %71 : vector<1x128x128xf32> to vector<128x128xf32>
    %cst_58 = arith.constant dense<0.000000e+00> : vector<32x128xf32>
    %73 = tpu.matmul %70, %72, %cst_58 {dimension_numbers = #tpu.dot_dimension_numbers<[1], [0], [0], [1], [0, 0, 1, 1], [], []>} : vector<32x128xf32>, vector<128x128xf32>, vector<32x128xf32> -> vector<32x128xf32>
    %74 = arith.addf %65, %73 : vector<32x128xf32>
    %c30_i32_59 = arith.constant 30 : i32
    %75 = tpu.dynamic_rotate %44 by %c30_i32_59 dim 0 : vector<32x128xf32>, i32 -> vector<32x128xf32>
    %c4_60 = arith.constant 4 : index
    %c0_61 = arith.constant 0 : index
    %c0_62 = arith.constant 0 : index
    %76 = vector.load %arg2[%c4_60, %c0_61, %c0_62] : memref<5x32x1xf32, #tpu.memory_space<vmem>>, vector<1x32x1xf32>
    %77 = vector.shape_cast %76 : vector<1x32x1xf32> to vector<32x1xf32>
    %78 = vector.broadcast %77 : vector<32x1xf32> to vector<32x128xf32>
    %79 = arith.mulf %75, %78 : vector<32x128xf32>
    %c4_63 = arith.constant 4 : index
    %c0_64 = arith.constant 0 : index
    %c0_65 = arith.constant 0 : index
    %80 = vector.load %arg5[%c4_63, %c0_64, %c0_65] : memref<5x128x128xf32, #tpu.memory_space<vmem>>, vector<1x128x128xf32>
    %81 = vector.shape_cast %80 : vector<1x128x128xf32> to vector<128x128xf32>
    %cst_66 = arith.constant dense<0.000000e+00> : vector<32x128xf32>
    %82 = tpu.matmul %79, %81, %cst_66 {dimension_numbers = #tpu.dot_dimension_numbers<[1], [0], [0], [1], [0, 0, 1, 1], [], []>} : vector<32x128xf32>, vector<128x128xf32>, vector<32x128xf32> -> vector<32x128xf32>
    %83 = arith.addf %74, %82 : vector<32x128xf32>
    %c0_67 = arith.constant 0 : index
    %c0_68 = arith.constant 0 : index
    %84 = vector.load %arg6[%c0_67, %c0_68] : memref<1x128xf32, #tpu.memory_space<vmem>>, vector<1x128xf32>
    %85 = vector.broadcast %84 : vector<1x128xf32> to vector<32x128xf32>
    %86 = arith.addf %83, %85 : vector<32x128xf32>
    %cst_69 = arith.constant 0.000000e+00 : f32
    %87 = vector.broadcast %cst_69 : f32 to vector<32x128xf32>
    %88 = arith.maximumf %86, %87 : vector<32x128xf32>
    %89 = arith.addf %88, %0 : vector<32x128xf32>
    %cst_70 = arith.constant 0.000000e+00 : f32
    %90 = vector.broadcast %cst_70 : f32 to vector<32x128xf32>
    %91 = arith.maximumf %89, %90 : vector<32x128xf32>
    %c0_71 = arith.constant 0 : index
    %c0_72 = arith.constant 0 : index
    %92 = vector.load %arg7[%c0_71, %c0_72] : memref<32x128xf32, #tpu.memory_space<vmem>>, vector<32x128xf32>
    tpu.vector_store %arg7[%c0_71, %c0_72], %91 {strides = array<i32>} : memref<32x128xf32, #tpu.memory_space<vmem>>, vector<32x128xf32>,
    return
  }
  func.func @transform_0(%arg0: i32) -> (i32, i32) {
    %c0_i32 = arith.constant 0 : i32
    %c0_i32_0 = arith.constant 0 : i32
    return %arg0, %c0_i32 : i32, i32
  }
  func.func @transform_1(%arg0: i32) -> (i32, i32, i32) {
    %c0_i32 = arith.constant 0 : i32
    %c0_i32_0 = arith.constant 0 : i32
    %c0_i32_1 = arith.constant 0 : i32
    %c0_i32_2 = arith.constant 0 : i32
    return %c0_i32, %c0_i32_0, %c0_i32_1 : i32, i32, i32
  }
  func.func @transform_2(%arg0: i32) -> (i32, i32, i32) {
    %c0_i32 = arith.constant 0 : i32
    %c0_i32_0 = arith.constant 0 : i32
    %c0_i32_1 = arith.constant 0 : i32
    %c0_i32_2 = arith.constant 0 : i32
    return %c0_i32, %c0_i32_0, %c0_i32_1 : i32, i32, i32
  }
  func.func @transform_3(%arg0: i32) -> (i32, i32) {
    %c0_i32 = arith.constant 0 : i32
    %c0_i32_0 = arith.constant 0 : i32
    %c0_i32_1 = arith.constant 0 : i32
    return %c0_i32, %c0_i32_0 : i32, i32
  }
  func.func @transform_4(%arg0: i32) -> (i32, i32, i32) {
    %c0_i32 = arith.constant 0 : i32
    %c0_i32_0 = arith.constant 0 : i32
    %c0_i32_1 = arith.constant 0 : i32
    %c0_i32_2 = arith.constant 0 : i32
    return %c0_i32, %c0_i32_0, %c0_i32_1 : i32, i32, i32
  }
  func.func @transform_5(%arg0: i32) -> (i32, i32) {
    %c0_i32 = arith.constant 0 : i32
    %c0_i32_0 = arith.constant 0 : i32
    %c0_i32_1 = arith.constant 0 : i32
    return %c0_i32, %c0_i32_0 : i32, i32
  }
  func.func @transform_6(%arg0: i32) -> (i32, i32) {
    %c0_i32 = arith.constant 0 : i32
    %c0_i32_0 = arith.constant 0 : i32
    return %arg0, %c0_i32 : i32, i32
  }
}

</mosaic_0001>

<bundles_post_ra>
// kernel: tile.28
= control target key start
LH: loop header
LB: loop body
LE: loop exit
PB: predicated region body
PF: predicated region fallthrough
CT: control target
= control target key end

     0   :  { %s22_s0 = inlined_call_operand.vmem [shape: f32[16], index: 0, kind: input, shape index: {}]   ;;  %s23_s1 = inlined_call_operand.vmem [shape: f32[2,16], index: 1, kind: output, shape index: {}]  }
   0x1   :  { %v4_v0 = vld [vmem:[%s22_s0] ss:$0 sm:$0xff] }
   0x2   :  { %5 = vst [vmem:[%s23_s1] sm:$0x3] %v4_v0 }

// kernel: tile.45
= control target key start
LH: loop header
LB: loop body
LE: loop exit
PB: predicated region body
PF: predicated region fallthrough
CT: control target
= control target key end

     0   :  { %vm7_vm0 = vcmask 130048   ;;  %vm13_vm1 = vcmask 261248   ;;  %s39_s0 = inlined_call_operand.vmem [shape: f32[2,16], index: 0, kind: input, shape index: {}]   ;;  %s40_s1 = inlined_call_operand.vmem [shape: f32[1,32], index: 1, kind: output, shape index: {}]  }
   0x1   :  { %v4_v0 = vld [vmem:[%s39_s0] sm:$0x3]  ;;  %s22_s0 = smov 16  }
   0x2   :  { %5 = vst [vmem:[#allocation1] sm:$0x3] %v4_v0 }
   0x9   :  { %v10_v1 = vld [vmem:[#allocation1 + $0x1] sm:$0x1]   ;;  %v6_v2 = vld [vmem:[#allocation1] sm:$0x1]  }
   0xa   :  { %11 = vrot.lane.b32.xlu0 %v10_v1, %s22_s0  ;;  %8 = vst.msk [vmem:[#allocation0] sm:$0x1] %vm7_vm0, %v6_v2  }
  0x7c   :  { %v12_v3 = vpop.permute.xlu0 %11  }
  0x7d   :  { %14 = vst.msk [vmem:[#allocation0] sm:$0x1] %vm13_vm1, %v12_v3  }
  0x84   :  { %v18_v4 = vld [vmem:[#allocation0] sm:$0x1] }
  0x85   :  { %20 = vst [vmem:[%s40_s1] sm:$0x1] %v18_v4 }

// kernel: blaze_block_nchw.1
= control target key start
LH: loop header
LB: loop body
LE: loop exit
PB: predicated region body
PF: predicated region fallthrough
CT: control target
= control target key end

     0   :  { %v2397_v0 = vmov 0   ;;  %v48_v44 = vlaneseq  ;;  %s3230_s1 = inlined_call_operand.vmem [shape: f32[5,32,1], index: 1, kind: input, shape index: {}]   ;;  %s3231_s2 = inlined_call_operand.vmem [shape: f32[5,128,128], index: 2, kind: input, shape index: {}]   ;;  %s3232_s0 = inlined_call_operand.vmem [shape: f32[32,128], index: 0, kind: input, shape index: {}]   ;;  %s3233_s4 = inlined_call_operand.vmem [shape: f32[5,128,128], index: 4, kind: input, shape index: {}]   ;;  %s3234_s3 = inlined_call_operand.vmem [shape: f32[1,128], index: 3, kind: input, shape index: {}]   ;;  %s3235_s5 = inlined_call_operand.vmem [shape: f32[1,128], index: 5, kind: input, shape index: {}]   ;;  %s3236_s6 = inlined_call_operand.vmem [shape: f32[32,128], index: 6, kind: output, shape index: {}]  }
   0x1   :  { %2392 = vset.pattern.permute.xlu1 %v2397_v0  ;;  %2391 = vset.pattern.permute.xlu0 %v2397_v0  ;;  %v57_v1 = vld [vmem:[%s3230_s1 + $0x10] sm:$0xff]  ;;  %v55_v2 = vld [vmem:[%s3230_s1] sm:$0xff]  ;;  %v58_v3 = vld [vmem:[%s3230_s1 + $0x18] sm:$0xff] }
   0x2   :  { %71 = vperm.xlu1 %2392, %v57_v1   ;;  %61 = vperm.xlu0 %2391, %v55_v2   ;;  %v56_v4 = vld [vmem:[%s3230_s1 + $0x8] sm:$0xff]  ;;  %v83_v6 = vld [vmem:[%s3231_s2] sm:$0xff]  ;;  %v85_v10 = vld [vmem:[%s3231_s2 + $0x10] sm:$0xff]  ;;  %v2535_v45 = vshrl.u32 %v48_v44, 7 }
   0x3   :  { %v1333_v5 = vld [vmem:[%s3230_s1 + $0x28] sm:$0xff]  ;;  %v1332_v8 = vld [vmem:[%s3230_s1 + $0x20] sm:$0xff]  ;;  %v86_v11 = vld [vmem:[%s3231_s2 + $0x18] sm:$0xff] }
   0x4   :  { %v84_v7 = vld [vmem:[%s3231_s2 + $0x8] sm:$0xff]  ;;  %v2042_v12 = vpack.c.bf16 %v86_v11, %v85_v10  ;;  %v87_v13 = vld [vmem:[%s3231_s2 + $0x20] sm:$0xff]  ;;  %v1335_v15 = vld [vmem:[%s3230_s1 + $0x38] sm:$0xff]  ;;  %vm50_vm0 = vcmp.lt.s32.totalorder %v2535_v45, 2  ;;  %vm273_vm1 = vcmp.lt.s32.totalorder %v2535_v45, 1  ;;  %vm417_vm2 = vcmp.lt.s32.totalorder %v2535_v45, 7 }
   0x5   :  { %v2038_v9 = vpack.c.bf16 %v84_v7, %v83_v6  ;;  %v88_v14 = vld [vmem:[%s3231_s2 + $0x28] sm:$0xff]  ;;  %v1334_v16 = vld [vmem:[%s3230_s1 + $0x30] sm:$0xff]  ;;  %v90_v19 = vld [vmem:[%s3231_s2 + $0x38] sm:$0xff]  ;;  %vm561_vm3 = vcmp.lt.s32.totalorder %v2535_v45, 6 }
   0x6   :  { %76 = vperm.xlu1 %2392, %v58_v3   ;;  %66 = vperm.xlu0 %2391, %v56_v4   ;;  %v2046_v17 = vpack.c.bf16 %v88_v14, %v87_v13  ;;  %v89_v18 = vld [vmem:[%s3231_s2 + $0x30] sm:$0xff]  ;;  %v1353_v20 = vld [vmem:[%s3230_s1 + $0x68] sm:$0xff]  ;;  %v1352_v21 = vld [vmem:[%s3230_s1 + $0x60] sm:$0xff] }
   0x7   :  { %2039 = vmatprep.subr.bf16.mxu0 %v2038_v9  ;;  %v2050_v22 = vpack.c.bf16 %v90_v19, %v89_v18  ;;  %v91_v23 = vld [vmem:[%s3231_s2 + $0x40] sm:$0xff]  ;;  %v92_v24 = vld [vmem:[%s3231_s2 + $0x48] sm:$0xff]  ;;  %v1355_v25 = vld [vmem:[%s3230_s1 + $0x78] sm:$0xff] }
   0x8   :  { %2041 = vmatpush3.bf16.msra.mxu0 %v2038_v9  ;;  %v1354_v26 = vld [vmem:[%s3230_s1 + $0x70] sm:$0xff]  ;;  %v2054_v27 = vpack.c.bf16 %v92_v24, %v91_v23  ;;  %v94_v29 = vld [vmem:[%s3231_s2 + $0x58] sm:$0xff]  ;;  %v1373_v30 = vld [vmem:[%s3230_s1 + $0x88] sm:$0xff] }
   0x9   :  { %2043 = vmatprep.subr.bf16.mxu0 %v2042_v12  ;;  %v93_v28 = vld [vmem:[%s3231_s2 + $0x50] sm:$0xff]  ;;  %v1372_v31 = vld [vmem:[%s3230_s1 + $0x80] sm:$0xff]  ;;  %v96_v34 = vld [vmem:[%s3231_s2 + $0x68] sm:$0xff] }
   0xa   :  { %290 = vperm.xlu1 %2392, %v1333_v5   ;;  %285 = vperm.xlu0 %2391, %v1332_v8   ;;  %v2058_v32 = vpack.c.bf16 %v94_v29, %v93_v28  ;;  %v95_v33 = vld [vmem:[%s3231_s2 + $0x60] sm:$0xff]  ;;  %v1375_v35 = vld [vmem:[%s3230_s1 + $0x98] sm:$0xff]  ;;  %v1374_v36 = vld [vmem:[%s3230_s1 + $0x90] sm:$0xff] }
   0xb   :  { %v2062_v37 = vpack.c.bf16 %v96_v34, %v95_v33  ;;  %v97_v38 = vld [vmem:[%s3231_s2 + $0x70] sm:$0xff]  ;;  %v98_v39 = vld [vmem:[%s3231_s2 + $0x78] sm:$0xff]  ;;  %v1316_v41 = vld [vmem:[%s3231_s2 + $0x100] sm:$0xff] }
   0xc   :  { %2045 = vmatpush3.bf16.msra.mxu0 %v2042_v12  ;;  %v2066_v40 = vpack.c.bf16 %v98_v39, %v97_v38  ;;  %v1317_v42 = vld [vmem:[%s3231_s2 + $0x108] sm:$0xff]  ;;  %v2540_v46 = vld [vmem:[%s3232_s0] sm:$0xff]  ;;  %v2545_v47 = vld [vmem:[%s3232_s0 + $0x18] sm:$0xff] }
   0xd   :  { %2047 = vmatprep.subr.bf16.mxu0 %v2046_v17  ;;  %v2070_v43 = vpack.c.bf16 %v1317_v42, %v1316_v41  ;;  %v44_v48 = vrot.slane %v2540_v46, 6  ;;  %v47_v49 = vrot.slane %v2545_v47, 6  ;;  %v2553_v50 = vld [vmem:[%s3232_s0 + $0x8] sm:$0xff]  ;;  %v2558_v51 = vld [vmem:[%s3232_s0 + $0x10] sm:$0xff]  ;;  %v1319_v61 = vld [vmem:[%s3231_s2 + $0x118] sm:$0xff]  ;;  %v272_v44 = vrot.slane %v2545_v47, 7 }
   0xe   :  { %300 = vperm.xlu1 %2392, %v1335_v15   ;;  %295 = vperm.xlu0 %2391, %v1334_v16   ;;  %v46_v52 = vrot.slane %v2558_v51, 6  ;;  %v45_v53 = vrot.slane %v2553_v50, 6  ;;  %v1318_v60 = vld [vmem:[%s3231_s2 + $0x110] sm:$0xff]  ;;  %v1320_v4 = vld [vmem:[%s3231_s2 + $0x120] sm:$0xff]  ;;  %v1321_v5 = vld [vmem:[%s3231_s2 + $0x128] sm:$0xff] }
   0xf   :  { %v54_v54 = vsel %vm50_vm0, %v47_v49, %v44_v48  ;;  %v2074_v2 = vpack.c.bf16 %v1319_v61, %v1318_v60  ;;  %v2078_v7 = vpack.c.bf16 %v1321_v5, %v1320_v4  ;;  %v1322_v8 = vld [vmem:[%s3231_s2 + $0x130] sm:$0xff]  ;;  %v1323_v9 = vld [vmem:[%s3231_s2 + $0x138] sm:$0xff]  ;;  %v745_v10 = vld [vmem:[%s3233_s4] sm:$0xff] }
  0x10   :  { %2049 = vmatpush3.bf16.msra.mxu0 %v2046_v17  ;;  %v52_v57 = vsel %vm50_vm0, %v45_v53, %v46_v52  ;;  %v53_v59 = vsel %vm50_vm0, %v44_v48, %v45_v53  ;;  %v51_v63 = vsel %vm50_vm0, %v46_v52, %v47_v49  ;;  %v746_v11 = vld [vmem:[%s3233_s4 + $0x8] sm:$0xff]  ;;  %v747_v12 = vld [vmem:[%s3233_s4 + $0x10] sm:$0xff]  ;;  %v2082_v13 = vpack.c.bf16 %v1323_v9, %v1322_v8  ;;  %v1324_v14 = vld [vmem:[%s3231_s2 + $0x140] sm:$0xff] }
  0x11   :  { %2051 = vmatprep.subr.bf16.mxu0 %v2050_v22  ;;  %v2198_v15 = vpack.c.bf16 %v746_v11, %v745_v10  ;;  %v748_v16 = vld [vmem:[%s3233_s4 + $0x18] sm:$0xff]  ;;  %v1325_v17 = vld [vmem:[%s3231_s2 + $0x148] sm:$0xff]  ;;  %v749_v19 = vld [vmem:[%s3233_s4 + $0x20] sm:$0xff] }
  0x12   :  { %434 = vperm.xlu1 %2392, %v1353_v20   ;;  %429 = vperm.xlu0 %2391, %v1352_v21   ;;  %v2202_v18 = vpack.c.bf16 %v748_v16, %v747_v12  ;;  %v750_v20 = vld [vmem:[%s3233_s4 + $0x28] sm:$0xff]  ;;  %v2086_v21 = vpack.c.bf16 %v1325_v17, %v1324_v14  ;;  %v1327_v24 = vld [vmem:[%s3231_s2 + $0x158] sm:$0xff]  ;;  %v1328_v28 = vld [vmem:[%s3231_s2 + $0x160] sm:$0xff]  ;;  %v270_v14 = vrot.slane %v2553_v50, 7 }
  0x13   :  { %2199 = vmatprep.subr.bf16.mxu1 %v2198_v15  ;;  %v2206_v23 = vpack.c.bf16 %v750_v20, %v749_v19  ;;  %v1336_v38 = vld [vmem:[%s3231_s2 + $0x80] sm:$0xff]  ;;  %v1337_v39 = vld [vmem:[%s3231_s2 + $0x88] sm:$0xff]  ;;  %v1338_v41 = vld [vmem:[%s3231_s2 + $0x90] sm:$0xff] }
  0x14   :  { %2053 = vmatpush3.bf16.msra.mxu0 %v2050_v22  ;;  %2201 = vmatpush3.bf16.msra.mxu1 %v2198_v15  ;;  %v1326_v22 = vld [vmem:[%s3231_s2 + $0x150] sm:$0xff]  ;;  %v1339_v42 = vld [vmem:[%s3231_s2 + $0x98] sm:$0xff]  ;;  %v1340_v49 = vld [vmem:[%s3231_s2 + $0xa0] sm:$0xff]  ;;  %v271_v15 = vrot.slane %v2558_v51, 7 }
  0x15   :  { %2055 = vmatprep.subr.bf16.mxu0 %v2054_v27  ;;  %2203 = vmatprep.subr.bf16.mxu1 %v2202_v18  ;;  %v2106_v48 = vpack.c.bf16 %v1339_v42, %v1338_v41  ;;  %v1341_v52 = vld [vmem:[%s3231_s2 + $0xa8] sm:$0xff]  ;;  %v1343_v60 = vld [vmem:[%s3231_s2 + $0xb8] sm:$0xff]  ;;  %v1350_v9 = vld [vmem:[%s3231_s2 + $0xf0] sm:$0xff] }
  0x16   :  { %444 = vperm.xlu1 %2392, %v1355_v25   ;;  %439 = vperm.xlu0 %2391, %v1354_v26   ;;  %v751_v25 = vld [vmem:[%s3233_s4 + $0x30] sm:$0xff]  ;;  %v752_v26 = vld [vmem:[%s3233_s4 + $0x38] sm:$0xff]  ;;  %v1356_v12 = vld [vmem:[%s3231_s2 + $0x180] sm:$0xff] }
  0x17   :  { %v2210_v29 = vpack.c.bf16 %v752_v26, %v751_v25  ;;  %v1347_v4 = vld [vmem:[%s3231_s2 + $0xd8] sm:$0xff]  ;;  %v1358_v20 = vld [vmem:[%s3231_s2 + $0x190] sm:$0xff]  ;;  %v1365_v41 = vld [vmem:[%s3231_s2 + $0x1c8] sm:$0xff] }
  0x18   :  { %2057 = vmatpush3.bf16.msra.mxu0 %v2054_v27  ;;  %2205 = vmatpush3.bf16.msra.mxu1 %v2202_v18  ;;  %v2090_v27 = vpack.c.bf16 %v1327_v24, %v1326_v22  ;;  %v1351_v10 = vld [vmem:[%s3231_s2 + $0xf8] sm:$0xff]  ;;  %v275_v22 = vsel %vm273_vm1, %v270_v14, %v271_v15  ;;  %v413_v24 = vrot.slane %v2540_v46, 1  ;;  %v1403_v45 = vld [vmem:[%s3233_s4 + $0x150] sm:$0xff] }
  0x19   :  { %2059 = vmatprep.subr.bf16.mxu0 %v2058_v32  ;;  %2207 = vmatprep.subr.bf16.mxu1 %v2206_v23  ;;  %v2130_v11 = vpack.c.bf16 %v1351_v10, %v1350_v9  ;;  %v558_v9 = vrot.slane %v2553_v50, 2  ;;  %v557_v10 = vrot.slane %v2540_v46, 2 }
  0x1a   :  { %578 = vperm.xlu1 %2392, %v1373_v30   ;;  %573 = vperm.xlu0 %2391, %v1372_v31   ;;  %v1329_v30 = vld [vmem:[%s3231_s2 + $0x168] sm:$0xff]  ;;  %v753_v31 = vld [vmem:[%s3233_s4 + $0x40] sm:$0xff] }
  0x1b   :  { %v2094_v33 = vpack.c.bf16 %v1329_v30, %v1328_v28  ;;  %v1361_v30 = vld [vmem:[%s3231_s2 + $0x1a8] sm:$0xff] }
  0x1c   :  { %2061 = vmatpush3.bf16.msra.mxu0 %v2058_v32  ;;  %v754_v32 = vld [vmem:[%s3233_s4 + $0x48] sm:$0xff]  ;;  %2209 = vmatpush3.bf16.msra.mxu1 %v2206_v23  ;;  %v414_v23 = vrot.slane %v2553_v50, 1 }
  0x1d   :  { %2063 = vmatprep.subr.bf16.mxu0 %v2062_v37  ;;  %2211 = vmatprep.subr.bf16.mxu1 %v2210_v29  ;;  %v2214_v34 = vpack.c.bf16 %v754_v32, %v753_v31 }
  0x1e   :  { %588 = vperm.xlu1 %2392, %v1375_v35   ;;  %583 = vperm.xlu0 %2391, %v1374_v36   ;;  %v1330_v35 = vld [vmem:[%s3231_s2 + $0x170] sm:$0xff]  ;;  %v1331_v36 = vld [vmem:[%s3231_s2 + $0x178] sm:$0xff]  ;;  %v420_v32 = vsel %vm417_vm2, %v413_v24, %v414_v23 }
  0x20   :  { %2065 = vmatpush3.bf16.msra.mxu0 %v2062_v37  ;;  %2213 = vmatpush3.bf16.msra.mxu1 %v2210_v29  ;;  %v2098_v37 = vpack.c.bf16 %v1331_v36, %v1330_v35  ;;  %v1360_v29 = vld [vmem:[%s3231_s2 + $0x1a0] sm:$0xff] }
  0x21   :  { %2067 = vmatprep.subr.bf16.mxu0 %v2066_v40  ;;  %2215 = vmatprep.subr.bf16.mxu1 %v2214_v34  ;;  %v2142_v35 = vpack.c.bf16 %v1361_v30, %v1360_v29  ;;  %v1386_v29 = vld [vmem:[%s3231_s2 + $0x250] sm:$0xff]  ;;  %v1387_v30 = vld [vmem:[%s3231_s2 + $0x258] sm:$0xff] }
  0x24   :  { %2069 = vmatpush3.bf16.msra.mxu0 %v2066_v40  ;;  %2217 = vmatpush3.bf16.msra.mxu1 %v2214_v34  ;;  %v2102_v40 = vpack.c.bf16 %v1337_v39, %v1336_v38  ;;  %v1363_v38 = vld [vmem:[%s3231_s2 + $0x1b8] sm:$0xff] }
  0x25   :  { %2071 = vmatprep.subr.bf16.mxu0 %v2070_v43 }
  0x81   :  { %v2564_v55 = vpop.permute.xlu1 %71  ;;  %v2566_v56 = vpop.permute.xlu0 %61 }
  0x82   :  { %v79_v58 = vmul.f32 %v2566_v56, %v54_v54  ;;  %v81_v62 = vmul.f32 %v2564_v55, %v52_v57  ;;  %v2110_v57 = vpack.c.bf16 %v1341_v52, %v1340_v49  ;;  %v1368_v49 = vld [vmem:[%s3231_s2 + $0x1e0] sm:$0xff]  ;;  %v1369_v52 = vld [vmem:[%s3231_s2 + $0x1e8] sm:$0xff] }
  0x84   :  { %1690 = vmatprep.mubr.f32.mxu0 %v79_v58 }
  0x85   :  { %v2582_v0 = vpop.permute.xlu0 %66  ;;  %v2585_v3 = vpop.permute.xlu1 %76 }
  0x86   :  { %v80_v1 = vmul.f32 %v2582_v0, %v53_v59  ;;  %v82_v6 = vmul.f32 %v2585_v3, %v51_v63  ;;  %v1342_v59 = vld [vmem:[%s3231_s2 + $0xb0] sm:$0xff]  ;;  %v1345_v63 = vld [vmem:[%s3231_s2 + $0xc8] sm:$0xff] }
  0x87   :  { %v2114_v61 = vpack.c.bf16 %v1343_v60, %v1342_v59  ;;  %v1376_v60 = vld [vmem:[%s3231_s2 + $0x200] sm:$0xff] }
  0x88   :  { %1691 = vmatmul.mubr.f32.vlgmr.msra.gmra.mrb[0].mxu0 %v80_v1 }
  0x89   :  { %2073 = vmatpush3.bf16.msra.mxu0 %v2070_v43  ;;  %1693 = vmatprep.mubr.f32.mxu0 %v81_v62  ;;  %v269_v43 = vrot.slane %v2540_v46, 7  ;;  %v2676_v53 = vpop.permute.xlu0 %285  ;;  %v1344_v62 = vld [vmem:[%s3231_s2 + $0xc0] sm:$0xff]  ;;  %v2726_v18 = vpop.permute.xlu1 %290 }
  0x8a   :  { %2075 = vmatprep.subr.bf16.mxu0 %v2074_v2  ;;  %v2118_v1 = vpack.c.bf16 %v1345_v63, %v1344_v62  ;;  %v415_v62 = vrot.slane %v2558_v51, 1  ;;  %v416_v63 = vrot.slane %v2545_v47, 1 }
  0x8b   :  { %v277_v54 = vsel %vm273_vm1, %v272_v44, %v269_v43  ;;  %v276_v19 = vsel %vm273_vm1, %v269_v43, %v270_v14  ;;  %v1366_v43 = vld [vmem:[%s3231_s2 + $0x1d0] sm:$0xff] }
  0x8c   :  { %1694 = vmatmul.mubr.f32.gmra.mrb[2].mxu0 %v82_v6  ;;  %v303_v58 = vmul.f32 %v2676_v53, %v277_v54  ;;  %v1348_v6 = vld [vmem:[%s3231_s2 + $0xe0] sm:$0xff]  ;;  %v304_v25 = vmul.f32 %v2726_v18, %v276_v19  ;;  %v2158_v54 = vpack.c.bf16 %v1369_v52, %v1368_v49  ;;  %v564_v19 = vsel %vm561_vm3, %v557_v10, %v558_v9 }
  0x8d   :  { %2077 = vmatpush3.bf16.msra.mxu0 %v2074_v2  ;;  %1728 = vmatprep.mubr.f32.mxu0 %v2540_v46  ;;  %v1346_v2 = vld [vmem:[%s3231_s2 + $0xd0] sm:$0xff]  ;;  %v2724_v16 = vpop.permute.xlu0 %295 }
  0x8e   :  { %2079 = vmatprep.subr.bf16.mxu0 %v2078_v7  ;;  %v2122_v5 = vpack.c.bf16 %v1347_v4, %v1346_v2  ;;  %v305_v28 = vmul.f32 %v2724_v16, %v275_v22 }
  0x91   :  { %2081 = vmatpush3.bf16.msra.mxu0 %v2078_v7  ;;  %v1349_v7 = vld [vmem:[%s3231_s2 + $0xe8] sm:$0xff]  ;;  %v2753_v31 = vpop.permute.xlu0 %429 }
  0x92   :  { %2083 = vmatprep.subr.bf16.mxu0 %v2082_v13  ;;  %v2126_v8 = vpack.c.bf16 %v1349_v7, %v1348_v6  ;;  %v447_v36 = vmul.f32 %v2753_v31, %v420_v32  ;;  %v1378_v6 = vld [vmem:[%s3231_s2 + $0x210] sm:$0xff]  ;;  %v1379_v7 = vld [vmem:[%s3231_s2 + $0x218] sm:$0xff]  ;;  %v2186_v32 = vpack.c.bf16 %v1387_v30, %v1386_v29 }
  0x95   :  { %2085 = vmatpush3.bf16.msra.mxu0 %v2082_v13  ;;  %v1357_v13 = vld [vmem:[%s3231_s2 + $0x188] sm:$0xff] }
  0x96   :  { %2087 = vmatprep.subr.bf16.mxu0 %v2086_v21  ;;  %v2134_v17 = vpack.c.bf16 %v1357_v13, %v1356_v12  ;;  %v2170_v12 = vpack.c.bf16 %v1379_v7, %v1378_v6  ;;  %v421_v13 = vsel %vm417_vm2, %v416_v63, %v413_v24  ;;  %v1383_v24 = vld [vmem:[%s3231_s2 + $0x238] sm:$0xff]  ;;  %v1393_v6 = vld [vmem:[%s3233_s4 + $0x100] sm:$0xff]  ;;  %v1394_v7 = vld [vmem:[%s3233_s4 + $0x108] sm:$0xff] }
  0x99   :  { %2089 = vmatpush3.bf16.msra.mxu0 %v2086_v21  ;;  %v1359_v21 = vld [vmem:[%s3231_s2 + $0x198] sm:$0xff] }
  0x9a   :  { %2091 = vmatprep.subr.bf16.mxu0 %v2090_v27  ;;  %v2138_v26 = vpack.c.bf16 %v1359_v21, %v1358_v20 }
  0x9d   :  { %2093 = vmatpush3.bf16.msra.mxu0 %v2090_v27  ;;  %v274_v27 = vsel %vm273_vm1, %v271_v15, %v272_v44  ;;  %v1367_v44 = vld [vmem:[%s3231_s2 + $0x1d8] sm:$0xff]  ;;  %v1381_v15 = vld [vmem:[%s3231_s2 + $0x228] sm:$0xff] }
  0x9e   :  { %2095 = vmatprep.subr.bf16.mxu0 %v2094_v33 }
  0xa1   :  { %2097 = vmatpush3.bf16.msra.mxu0 %v2094_v33  ;;  %v2759_v33 = vpop.permute.xlu1 %300 }
  0xa2   :  { %2099 = vmatprep.subr.bf16.mxu0 %v2098_v37  ;;  %v306_v34 = vmul.f32 %v2759_v33, %v274_v27  ;;  %v1385_v27 = vld [vmem:[%s3231_s2 + $0x248] sm:$0xff] }
  0xa5   :  { %2101 = vmatpush3.bf16.msra.mxu0 %v2098_v37  ;;  %v1362_v37 = vld [vmem:[%s3231_s2 + $0x1b0] sm:$0xff]  ;;  %v2803_v4 = vpop.permute.xlu1 %434 }
  0xa6   :  { %2103 = vmatprep.subr.bf16.mxu0 %v2102_v40  ;;  %v2146_v39 = vpack.c.bf16 %v1363_v38, %v1362_v37  ;;  %v1390_v37 = vld [vmem:[%s3231_s2 + $0x270] sm:$0xff]  ;;  %v1391_v38 = vld [vmem:[%s3231_s2 + $0x278] sm:$0xff] }
  0xa8   :  { %1729 = vmatmul.mubr.f32.vlgmr.msra.gmra.mrb[0].mxu0 %v2553_v50  ;;  %v1380_v50 = vld [vmem:[%s3231_s2 + $0x220] sm:$0xff] }
  0xa9   :  { %2105 = vmatpush3.bf16.msra.mxu0 %v2102_v40  ;;  %1731 = vmatprep.mubr.f32.mxu0 %v2558_v51  ;;  %v1364_v40 = vld [vmem:[%s3231_s2 + $0x1c0] sm:$0xff]  ;;  %v2834_v46 = vpop.permute.xlu1 %444  ;;  %v2174_v21 = vpack.c.bf16 %v1381_v15, %v1380_v50 }
  0xaa   :  { %2107 = vmatprep.subr.bf16.mxu0 %v2106_v48  ;;  %v2150_v42 = vpack.c.bf16 %v1365_v41, %v1364_v40  ;;  %v450_v20 = vmul.f32 %v2834_v46, %v421_v13  ;;  %v559_v40 = vrot.slane %v2558_v51, 2  ;;  %v560_v41 = vrot.slane %v2545_v47, 2 }
  0xac   :  { %1732 = vmatmul.mubr.f32.gmra.mrb[2].mxu0 %v2545_v47  ;;  %v565_v47 = vsel %vm561_vm3, %v560_v41, %v557_v10 }
  0xad   :  { %2109 = vmatpush3.bf16.msra.mxu0 %v2106_v48  ;;  %1766 = vmatprep.mubr.f32.mxu0 %v303_v58  ;;  %v2154_v48 = vpack.c.bf16 %v1367_v44, %v1366_v43  ;;  %v1371_v58 = vld [vmem:[%s3231_s2 + $0x1f8] sm:$0xff]  ;;  %v563_v43 = vsel %vm561_vm3, %v558_v9, %v559_v40  ;;  %v1392_v9 = vld [vmem:[%s3234_s3] ss:$0 sm:$0xff] }
  0xae   :  { %2111 = vmatprep.subr.bf16.mxu0 %v2110_v57 }
  0xb1   :  { %2113 = vmatpush3.bf16.msra.mxu0 %v2110_v57  ;;  %v1370_v57 = vld [vmem:[%s3231_s2 + $0x1f0] sm:$0xff] }
  0xb2   :  { %2115 = vmatprep.subr.bf16.mxu0 %v2114_v61  ;;  %v2162_v59 = vpack.c.bf16 %v1371_v58, %v1370_v57  ;;  %v755_v57 = vld [vmem:[%s3233_s4 + $0x50] sm:$0xff]  ;;  %v756_v58 = vld [vmem:[%s3233_s4 + $0x58] sm:$0xff] }
  0xb5   :  { %2117 = vmatpush3.bf16.msra.mxu0 %v2114_v61  ;;  %v1377_v61 = vld [vmem:[%s3231_s2 + $0x208] sm:$0xff] }
  0xb6   :  { %2119 = vmatprep.subr.bf16.mxu0 %v2118_v1  ;;  %v2166_v2 = vpack.c.bf16 %v1377_v61, %v1376_v60  ;;  %v757_v60 = vld [vmem:[%s3233_s4 + $0x60] sm:$0xff]  ;;  %v758_v61 = vld [vmem:[%s3233_s4 + $0x68] sm:$0xff] }
  0xb9   :  { %2121 = vmatpush3.bf16.msra.mxu0 %v2118_v1  ;;  %v2801_v1 = vpop.permute.xlu0 %439 }
  0xba   :  { %2123 = vmatprep.subr.bf16.mxu0 %v2122_v5 }
  0xbd   :  { %2125 = vmatpush3.bf16.msra.mxu0 %v2122_v5  ;;  %v419_v5 = vsel %vm417_vm2, %v414_v23, %v415_v62  ;;  %v1382_v23 = vld [vmem:[%s3231_s2 + $0x230] sm:$0xff] }
  0xbe   :  { %2127 = vmatprep.subr.bf16.mxu0 %v2126_v8 }
  0xc1   :  { %2129 = vmatpush3.bf16.msra.mxu0 %v2126_v8  ;;  %v418_v8 = vsel %vm417_vm2, %v415_v62, %v416_v63  ;;  %v2222_v62 = vpack.c.bf16 %v758_v61, %v757_v60  ;;  %v759_v63 = vld [vmem:[%s3233_s4 + $0x70] sm:$0xff] }
  0xc2   :  { %2131 = vmatprep.subr.bf16.mxu0 %v2130_v11  ;;  %v449_v14 = vmul.f32 %v2801_v1, %v418_v8  ;;  %v2230_v8 = vpack.c.bf16 %v1394_v7, %v1393_v6 }
  0xc5   :  { %2133 = vmatpush3.bf16.msra.mxu0 %v2130_v11  ;;  %v448_v11 = vmul.f32 %v2803_v4, %v419_v5 }
  0xc6   :  { %2135 = vmatprep.subr.bf16.mxu0 %v2134_v17 }
  0xc8   :  { %1767 = vmatmul.mubr.f32.vlgmr.msra.gmra.mrb[0].mxu0 %v304_v25  ;;  %v2178_v25 = vpack.c.bf16 %v1383_v24, %v1382_v23 }
  0xc9   :  { %1769 = vmatprep.mubr.f32.mxu0 %v305_v28  ;;  %2137 = vmatpush3.bf16.msra.mxu0 %v2134_v17  ;;  %v2830_v17 = vpop.permute.xlu0 %573 }
  0xca   :  { %2139 = vmatprep.subr.bf16.mxu0 %v2138_v26  ;;  %v591_v22 = vmul.f32 %v2830_v17, %v564_v19 }
  0xcc   :  { %1770 = vmatmul.mubr.f32.gmra.mrb[2].mxu0 %v306_v34  ;;  %v1388_v34 = vld [vmem:[%s3231_s2 + $0x260] sm:$0xff] }
  0xcd   :  { %2141 = vmatpush3.bf16.msra.mxu0 %v2138_v26  ;;  %1804 = vmatprep.mubr.f32.mxu0 %v447_v36  ;;  %v1384_v26 = vld [vmem:[%s3231_s2 + $0x240] sm:$0xff]  ;;  %v2874_v44 = vpop.permute.xlu0 %583 }
  0xce   :  { %2143 = vmatprep.subr.bf16.mxu0 %v2142_v35  ;;  %v2182_v28 = vpack.c.bf16 %v1385_v27, %v1384_v26  ;;  %v1395_v26 = vld [vmem:[%s3233_s4 + $0x110] sm:$0xff]  ;;  %v1396_v27 = vld [vmem:[%s3233_s4 + $0x118] sm:$0xff] }
  0xd1   :  { %2145 = vmatpush3.bf16.msra.mxu0 %v2142_v35  ;;  %v1389_v35 = vld [vmem:[%s3231_s2 + $0x268] sm:$0xff] }
  0xd2   :  { %2147 = vmatprep.subr.bf16.mxu0 %v2146_v39  ;;  %v2190_v36 = vpack.c.bf16 %v1389_v35, %v1388_v34 }
  0xd5   :  { %2149 = vmatpush3.bf16.msra.mxu0 %v2146_v39  ;;  %v2194_v39 = vpack.c.bf16 %v1391_v38, %v1390_v37  ;;  %v2234_v38 = vpack.c.bf16 %v1396_v27, %v1395_v26  ;;  %v1407_v27 = vld [vmem:[%s3233_s4 + $0x170] sm:$0xff] }
  0xd6   :  { %2151 = vmatprep.subr.bf16.mxu0 %v2150_v42 }
  0xd9   :  { %2153 = vmatpush3.bf16.msra.mxu0 %v2150_v42  ;;  %v2870_v42 = vpop.permute.xlu1 %578 }
  0xda   :  { %2155 = vmatprep.subr.bf16.mxu0 %v2154_v48  ;;  %v592_v49 = vmul.f32 %v2870_v42, %v563_v43 }
  0xdd   :  { %2157 = vmatpush3.bf16.msra.mxu0 %v2154_v48  ;;  %v562_v48 = vsel %vm561_vm3, %v559_v40, %v560_v41  ;;  %v2879_v52 = vpop.permute.xlu1 %588 }
  0xde   :  { %2159 = vmatprep.subr.bf16.mxu0 %v2158_v54  ;;  %v593_v51 = vmul.f32 %v2874_v44, %v562_v48 }
  0xe1   :  { %2161 = vmatpush3.bf16.msra.mxu0 %v2158_v54  ;;  %v594_v54 = vmul.f32 %v2879_v52, %v565_v47 }
  0xe2   :  { %2163 = vmatprep.subr.bf16.mxu0 %v2162_v59 }
  0xe5   :  { %2165 = vmatpush3.bf16.msra.mxu0 %v2162_v59  ;;  %v2218_v59 = vpack.c.bf16 %v756_v58, %v755_v57 }
  0xe6   :  { %2167 = vmatprep.subr.bf16.mxu0 %v2166_v2 }
  0xe7   :  { %2219 = vmatprep.subr.bf16.mxu1 %v2218_v59 }
  0xe8   :  { %1805 = vmatmul.mubr.f32.vlgmr.msra.gmra.mrb[0].mxu0 %v448_v11  ;;  %2221 = vmatpush3.bf16.msra.mxu1 %v2218_v59 }
  0xe9   :  { %1807 = vmatprep.mubr.f32.mxu0 %v449_v14  ;;  %2169 = vmatpush3.bf16.msra.mxu0 %v2166_v2  ;;  %v760_v2 = vld [vmem:[%s3233_s4 + $0x78] sm:$0xff] }
  0xea   :  { %2171 = vmatprep.subr.bf16.mxu0 %v2170_v12  ;;  %2223 = vmatprep.subr.bf16.mxu1 %v2222_v62  ;;  %v2226_v5 = vpack.c.bf16 %v760_v2, %v759_v63 }
  0xec   :  { %1808 = vmatmul.mubr.f32.gmra.mrb[2].mxu0 %v450_v20  ;;  %2225 = vmatpush3.bf16.msra.mxu1 %v2222_v62 }
  0xed   :  { %2173 = vmatpush3.bf16.msra.mxu0 %v2170_v12  ;;  %1842 = vmatprep.mubr.f32.mxu0 %v591_v22 }
  0xee   :  { %2175 = vmatprep.subr.bf16.mxu0 %v2174_v21  ;;  %2227 = vmatprep.subr.bf16.mxu1 %v2226_v5 }
  0xf0   :  { %2229 = vmatpush3.bf16.msra.mxu1 %v2226_v5 }
  0xf1   :  { %2177 = vmatpush3.bf16.msra.mxu0 %v2174_v21  ;;  %2231 = vmatprep.subr.bf16.mxu1 %v2230_v8 }
  0xf2   :  { %2179 = vmatprep.subr.bf16.mxu0 %v2178_v25 }
  0xf5   :  { %2181 = vmatpush3.bf16.msra.mxu0 %v2178_v25 }
  0xf6   :  { %2183 = vmatprep.subr.bf16.mxu0 %v2182_v28 }
  0xf9   :  { %2185 = vmatpush3.bf16.msra.mxu0 %v2182_v28 }
  0xfa   :  { %2187 = vmatprep.subr.bf16.mxu0 %v2186_v32 }
  0xfd   :  { %2189 = vmatpush3.bf16.msra.mxu0 %v2186_v32 }
  0xfe   :  { %2191 = vmatprep.subr.bf16.mxu0 %v2190_v36 }
 0x101   :  { %2193 = vmatpush3.bf16.msra.mxu0 %v2190_v36 }
 0x102   :  { %2195 = vmatprep.subr.bf16.mxu0 %v2194_v39 }
 0x105   :  { %2197 = vmatpush3.bf16.msra.mxu0 %v2194_v39 }
 0x108   :  { %1843 = vmatmul.mubr.f32.vlgmr.msra.gmra.mrb[0].mxu0 %v592_v49 }
 0x109   :  { %1845 = vmatprep.mubr.f32.mxu0 %v593_v51 }
 0x10c   :  { %1846 = vmatmul.mubr.f32.gmra.mrb[2].mxu0 %v594_v54 }
 0x1db   :  { %v1844_v10 = vpop.f32.mrb[0].mxu0 }
 0x1dc   :  { %v709_v11 = vadd.f32 %v1844_v10, %v1392_v9  ;;  %v678_v12 = vpop.f32.mrb[1].mxu0 }
 0x1dd   :  { %v708_v13 = vadd.f32 %v1392_v9, %v678_v12 }
 0x1de   :  { %v2912_v14 = vmax.f32 %v709_v11, 0.0 }
 0x1df   :  { %v712_v50 = vmax.f32 %v708_v13, 0.0  ;;  %v1847_v15 = vpop.f32.mrb[2].mxu0  ;;  %v1399_v13 = vld [vmem:[%s3233_s4 + $0x130] sm:$0xff] }
 0x1e0   :  { %v932_v19 = vrot.slane %v2912_v14, 7  ;;  %v711_v20 = vadd.f32 %v1847_v15, %v1392_v9  ;;  %v688_v21 = vpop.f32.mrb[3].mxu0  ;;  %v734_v22 = vrot.slane %v2912_v14, 6  ;;  %v1050_v23 = vrot.slane %v2912_v14, 1  ;;  %v1400_v15 = vld [vmem:[%s3233_s4 + $0x138] sm:$0xff] }
 0x1e1   :  { %v710_v24 = vadd.f32 %v1392_v9, %v688_v21  ;;  %v733_v25 = vrot.slane %v712_v50, 6  ;;  %v931_v28 = vrot.slane %v712_v50, 7  ;;  %v1049_v29 = vrot.slane %v712_v50, 1  ;;  %v1402_v21 = vld [vmem:[%s3233_s4 + $0x148] sm:$0xff] }
 0x1e2   :  { %v2923_v30 = vmax.f32 %v711_v20, 0.0  ;;  %v1167_v48 = vrot.slane %v712_v50, 2  ;;  %v1168_v54 = vrot.slane %v2912_v14, 2  ;;  %v1401_v20 = vld [vmem:[%s3233_s4 + $0x140] sm:$0xff] }
 0x1e3   :  { %v2925_v32 = vmax.f32 %v710_v24, 0.0  ;;  %v739_v34 = vsel %vm50_vm0, %v733_v25, %v734_v22  ;;  %v2931_v35 = vsel %vm273_vm1, %v931_v28, %v932_v19  ;;  %v2935_v36 = vsel %vm417_vm2, %v1049_v29, %v1050_v23  ;;  %v1405_v24 = vld [vmem:[%s3233_s4 + $0x160] sm:$0xff] }
 0x1e4   :  { %v736_v37 = vrot.slane %v2923_v30, 6  ;;  %v934_v39 = vrot.slane %v2923_v30, 7  ;;  %v1052_v51 = vrot.slane %v2923_v30, 1  ;;  %v742_v58 = vmul.f32 %v739_v34, %v2582_v0  ;;  %v1398_v0 = vld [vmem:[%s3233_s4 + $0x128] sm:$0xff]  ;;  %v1409_v34 = vld [vmem:[%s3233_s4 + $0x80] sm:$0xff] }
 0x1e5   :  { %v1051_v40 = vrot.slane %v2925_v32, 1  ;;  %v735_v41 = vrot.slane %v2925_v32, 6  ;;  %v933_v43 = vrot.slane %v2925_v32, 7  ;;  %v1169_v61 = vrot.slane %v2925_v32, 2 }
 0x1e6   :  { %v740_v49 = vsel %vm50_vm0, %v736_v37, %v733_v25  ;;  %v2946_v47 = vsel %vm273_vm1, %v934_v39, %v931_v28  ;;  %v2982_v6 = vsel %vm417_vm2, %v1052_v51, %v1049_v29  ;;  %v2986_v7 = vsel %vm561_vm3, %v1167_v48, %v1168_v54  ;;  %v1406_v25 = vld [vmem:[%s3233_s4 + $0x168] sm:$0xff]  ;;  %v1408_v28 = vld [vmem:[%s3233_s4 + $0x178] sm:$0xff] }
 0x1e7   :  { %v741_v57 = vmul.f32 %v740_v49, %v2566_v56  ;;  %v738_v59 = vsel %vm50_vm0, %v734_v22, %v735_v41  ;;  %v737_v60 = vsel %vm50_vm0, %v735_v41, %v736_v37  ;;  %v2960_v63 = vsel %vm273_vm1, %v932_v19, %v933_v43  ;;  %v1397_v56 = vld [vmem:[%s3233_s4 + $0x120] sm:$0xff]  ;;  %v1410_v37 = vld [vmem:[%s3233_s4 + $0x88] sm:$0xff] }
 0x1e8   :  { %v743_v62 = vmul.f32 %v738_v59, %v2564_v55  ;;  %v2964_v2 = vsel %vm273_vm1, %v933_v43, %v934_v39  ;;  %v2974_v55 = vsel %vm417_vm2, %v1050_v23, %v1051_v40  ;;  %v2978_v5 = vsel %vm417_vm2, %v1051_v40, %v1052_v51  ;;  %v1411_v39 = vld [vmem:[%s3233_s4 + $0x90] sm:$0xff]  ;;  %v1412_v40 = vld [vmem:[%s3233_s4 + $0x98] sm:$0xff]  ;;  %v1413_v43 = vld [vmem:[%s3233_s4 + $0xa0] sm:$0xff] }
 0x1e9   :  { %1880 = vmatprep.mubr.f32.mxu1 %v741_v57  ;;  %v1170_v9 = vrot.slane %v2923_v30, 2  ;;  %v744_v10 = vmul.f32 %v737_v60, %v2585_v3  ;;  %v2238_v11 = vpack.c.bf16 %v1398_v0, %v1397_v56  ;;  %v2992_v12 = vsel %vm561_vm3, %v1168_v54, %v1169_v61  ;;  %v1415_v54 = vld [vmem:[%s3233_s4 + $0xb0] sm:$0xff]  ;;  %v1416_v57 = vld [vmem:[%s3233_s4 + $0xb8] sm:$0xff]  ;;  %v1421_v60 = vld [vmem:[%s3233_s4 + $0xe0] sm:$0xff] }
 0x1ea   :  { %1881 = vmatmul.mubr.f32.vlgmr.msra.gmra.mrb[0].mxu1 %v742_v58  ;;  %v2242_v19 = vpack.c.bf16 %v1400_v15, %v1399_v13  ;;  %v2246_v22 = vpack.c.bf16 %v1402_v21, %v1401_v20  ;;  %v2254_v26 = vpack.c.bf16 %v1406_v25, %v1405_v24  ;;  %v2258_v29 = vpack.c.bf16 %v1408_v28, %v1407_v27  ;;  %v1419_v58 = vld [vmem:[%s3233_s4 + $0xd0] sm:$0xff]  ;;  %v1424_v0 = vld [vmem:[%s3233_s4 + $0xf8] sm:$0xff]  ;;  %v1437_v27 = vld [vmem:[%s3233_s4 + $0x1e0] sm:$0xff] }
 0x1eb   :  { %2233 = vmatpush3.bf16.msra.mxu1 %v2230_v8  ;;  %1883 = vmatprep.mubr.f32.mxu1 %v743_v62  ;;  %v3002_v8 = vsel %vm561_vm3, %v1169_v61, %v1170_v9  ;;  %v3006_v3 = vsel %vm561_vm3, %v1170_v9, %v1167_v48  ;;  %v2266_v41 = vpack.c.bf16 %v1412_v40, %v1411_v39  ;;  %v1414_v48 = vld [vmem:[%s3233_s4 + $0xa8] sm:$0xff]  ;;  %v1423_v56 = vld [vmem:[%s3233_s4 + $0xf0] sm:$0xff]  ;;  %v1436_v25 = vld [vmem:[%s3233_s4 + $0x1d8] sm:$0xff] }
 0x1ec   :  { %2235 = vmatprep.subr.bf16.mxu1 %v2234_v38  ;;  %v2270_v49 = vpack.c.bf16 %v1414_v48, %v1413_v43  ;;  %v939_v51 = vmul.f32 %v2946_v47, %v2676_v53  ;;  %v1418_v53 = vld [vmem:[%s3233_s4 + $0xc8] sm:$0xff]  ;;  %v2290_v9 = vpack.c.bf16 %v1424_v0, %v1423_v56  ;;  %v1427_v15 = vld [vmem:[%s3233_s4 + $0x190] sm:$0xff]  ;;  %v940_v20 = vmul.f32 %v2931_v35, %v2726_v18  ;;  %v1441_v39 = vld [vmem:[%s3233_s4 + $0x200] sm:$0xff] }
 0x1ed   :  { %v1422_v61 = vld [vmem:[%s3233_s4 + $0xe8] sm:$0xff]  ;;  %v1057_v35 = vmul.f32 %v2935_v36, %v2753_v31  ;;  %v1443_v43 = vld [vmem:[%s3233_s4 + $0x210] sm:$0xff]  ;;  %v1444_v48 = vld [vmem:[%s3233_s4 + $0x218] sm:$0xff]  ;;  %v1176_v0 = vmul.f32 %v2992_v12, %v2870_v42 }
 0x1ee   :  { %1884 = vmatmul.mubr.f32.gmra.mrb[2].mxu1 %v744_v10  ;;  %v2286_v62 = vpack.c.bf16 %v1422_v61, %v1421_v60  ;;  %v1425_v10 = vld [vmem:[%s3233_s4 + $0x180] sm:$0xff]  ;;  %v1434_v31 = vld [vmem:[%s3233_s4 + $0x1c8] sm:$0xff]  ;;  %v1455_v61 = vld [vmem:[%s3233_s4 + $0x270] sm:$0xff] }
 0x1ef   :  { %2237 = vmatpush3.bf16.msra.mxu1 %v2234_v38  ;;  %1918 = vmatprep.mubr.f32.mxu1 %v712_v50  ;;  %v1404_v50 = vld [vmem:[%s3233_s4 + $0x158] sm:$0xff]  ;;  %v2262_v38 = vpack.c.bf16 %v1410_v37, %v1409_v34  ;;  %v1438_v28 = vld [vmem:[%s3233_s4 + $0x1e8] sm:$0xff]  ;;  %v1439_v34 = vld [vmem:[%s3233_s4 + $0x1f0] sm:$0xff] }
 0x1f0   :  { %2239 = vmatprep.subr.bf16.mxu1 %v2238_v11  ;;  %v2250_v23 = vpack.c.bf16 %v1404_v50, %v1403_v45  ;;  %v1429_v45 = vld [vmem:[%s3233_s4 + $0x1a0] sm:$0xff]  ;;  %v1430_v50 = vld [vmem:[%s3233_s4 + $0x1a8] sm:$0xff]  ;;  %v1440_v37 = vld [vmem:[%s3233_s4 + $0x1f8] sm:$0xff] }
 0x1f1   :  { %v2302_v18 = vpack.c.bf16 %v1430_v50, %v1429_v45  ;;  %v1442_v40 = vld [vmem:[%s3233_s4 + $0x208] sm:$0xff] }
 0x1f3   :  { %2241 = vmatpush3.bf16.msra.mxu1 %v2238_v11  ;;  %v1426_v11 = vld [vmem:[%s3233_s4 + $0x188] sm:$0xff] }
 0x1f4   :  { %2243 = vmatprep.subr.bf16.mxu1 %v2242_v19  ;;  %v2294_v13 = vpack.c.bf16 %v1426_v11, %v1425_v10  ;;  %v1178_v10 = vmul.f32 %v3006_v3, %v2879_v52  ;;  %v1457_v11 = vld [vmem:[%s3235_s5] ss:$0 sm:$0xff] }
 0x1f5   :  { %v2394_v52 = vld [vmem:[%s3232_s0] sm:$0xff] }
 0x1f7   :  { %2245 = vmatpush3.bf16.msra.mxu1 %v2242_v19  ;;  %v1428_v19 = vld [vmem:[%s3233_s4 + $0x198] sm:$0xff] }
 0x1f8   :  { %2247 = vmatprep.subr.bf16.mxu1 %v2246_v22  ;;  %v2298_v21 = vpack.c.bf16 %v1428_v19, %v1427_v15 }
 0x1fb   :  { %2249 = vmatpush3.bf16.msra.mxu1 %v2246_v22  ;;  %v941_v22 = vmul.f32 %v2960_v63, %v2724_v16  ;;  %v1431_v16 = vld [vmem:[%s3233_s4 + $0x1b0] sm:$0xff]  ;;  %v1432_v63 = vld [vmem:[%s3233_s4 + $0x1b8] sm:$0xff] }
 0x1fc   :  { %2251 = vmatprep.subr.bf16.mxu1 %v2250_v23  ;;  %v2306_v24 = vpack.c.bf16 %v1432_v63, %v1431_v16  ;;  %v2395_v63 = vld [vmem:[%s3232_s0 + $0x18] sm:$0xff] }
 0x1ff   :  { %2253 = vmatpush3.bf16.msra.mxu1 %v2250_v23  ;;  %v942_v23 = vmul.f32 %v2964_v2, %v2759_v33  ;;  %v1433_v33 = vld [vmem:[%s3233_s4 + $0x1c0] sm:$0xff]  ;;  %v1435_v2 = vld [vmem:[%s3233_s4 + $0x1d0] sm:$0xff] }
 0x200   :  { %2255 = vmatprep.subr.bf16.mxu1 %v2254_v26  ;;  %v2310_v36 = vpack.c.bf16 %v1434_v31, %v1433_v33  ;;  %v2396_v33 = vld [vmem:[%s3232_s0 + $0x10] sm:$0xff] }
 0x203   :  { %2257 = vmatpush3.bf16.msra.mxu1 %v2254_v26  ;;  %v2314_v26 = vpack.c.bf16 %v1436_v25, %v1435_v2 }
 0x204   :  { %2259 = vmatprep.subr.bf16.mxu1 %v2258_v29 }
 0x207   :  { %2261 = vmatpush3.bf16.msra.mxu1 %v2258_v29  ;;  %v2318_v29 = vpack.c.bf16 %v1438_v28, %v1437_v27 }
 0x208   :  { %2263 = vmatprep.subr.bf16.mxu1 %v2262_v38 }
 0x20a   :  { %1919 = vmatmul.mubr.f32.vlgmr.msra.gmra.mrb[0].mxu1 %v2912_v14  ;;  %v2274_v14 = vpack.c.bf16 %v1416_v57, %v1415_v54  ;;  %v1059_v54 = vmul.f32 %v2978_v5, %v2801_v1  ;;  %v1445_v57 = vld [vmem:[%s3233_s4 + $0x220] sm:$0xff]  ;;  %v1447_v1 = vld [vmem:[%s3233_s4 + $0x230] sm:$0xff]  ;;  %v1448_v5 = vld [vmem:[%s3233_s4 + $0x238] sm:$0xff] }
 0x20b   :  { %1921 = vmatprep.mubr.f32.mxu1 %v2925_v32  ;;  %2265 = vmatpush3.bf16.msra.mxu1 %v2262_v38  ;;  %v1417_v32 = vld [vmem:[%s3233_s4 + $0xc0] sm:$0xff]  ;;  %v2322_v38 = vpack.c.bf16 %v1440_v37, %v1439_v34 }
 0x20c   :  { %2267 = vmatprep.subr.bf16.mxu1 %v2266_v41  ;;  %v2278_v47 = vpack.c.bf16 %v1418_v53, %v1417_v32  ;;  %v1060_v32 = vmul.f32 %v2982_v6, %v2834_v46  ;;  %v2338_v53 = vpack.c.bf16 %v1448_v5, %v1447_v1  ;;  %v1449_v46 = vld [vmem:[%s3233_s4 + $0x240] sm:$0xff] }
 0x20e   :  { %1922 = vmatmul.mubr.f32.gmra.mrb[2].mxu1 %v2923_v30  ;;  %v1420_v30 = vld [vmem:[%s3233_s4 + $0xd8] sm:$0xff] }
 0x20f   :  { %2269 = vmatpush3.bf16.msra.mxu1 %v2266_v41  ;;  %1956 = vmatprep.mubr.f32.mxu1 %v939_v51  ;;  %v2282_v59 = vpack.c.bf16 %v1420_v30, %v1419_v58  ;;  %v2326_v41 = vpack.c.bf16 %v1442_v40, %v1441_v39  ;;  %v2330_v51 = vpack.c.bf16 %v1444_v48, %v1443_v43  ;;  %v1453_v30 = vld [vmem:[%s3233_s4 + $0x260] sm:$0xff] }
 0x210   :  { %2271 = vmatprep.subr.bf16.mxu1 %v2270_v49 }
 0x213   :  { %2273 = vmatpush3.bf16.msra.mxu1 %v2270_v49  ;;  %v1058_v49 = vmul.f32 %v2974_v55, %v2803_v4  ;;  %v1175_v55 = vmul.f32 %v2986_v7, %v2830_v17  ;;  %v1450_v17 = vld [vmem:[%s3233_s4 + $0x248] sm:$0xff]  ;;  %v1451_v7 = vld [vmem:[%s3233_s4 + $0x250] sm:$0xff] }
 0x214   :  { %2275 = vmatprep.subr.bf16.mxu1 %v2274_v14  ;;  %v2342_v6 = vpack.c.bf16 %v1450_v17, %v1449_v46 }
 0x217   :  { %2277 = vmatpush3.bf16.msra.mxu1 %v2274_v14  ;;  %v1446_v14 = vld [vmem:[%s3233_s4 + $0x228] sm:$0xff] }
 0x218   :  { %2279 = vmatprep.subr.bf16.mxu1 %v2278_v47  ;;  %v2334_v4 = vpack.c.bf16 %v1446_v14, %v1445_v57 }
 0x21b   :  { %2281 = vmatpush3.bf16.msra.mxu1 %v2278_v47  ;;  %v1452_v47 = vld [vmem:[%s3233_s4 + $0x258] sm:$0xff] }
 0x21c   :  { %2283 = vmatprep.subr.bf16.mxu1 %v2282_v59  ;;  %v2346_v58 = vpack.c.bf16 %v1452_v47, %v1451_v7 }
 0x21f   :  { %2285 = vmatpush3.bf16.msra.mxu1 %v2282_v59  ;;  %v1454_v59 = vld [vmem:[%s3233_s4 + $0x268] sm:$0xff] }
 0x220   :  { %2287 = vmatprep.subr.bf16.mxu1 %v2286_v62  ;;  %v2350_v60 = vpack.c.bf16 %v1454_v59, %v1453_v30 }
 0x223   :  { %2289 = vmatpush3.bf16.msra.mxu1 %v2286_v62  ;;  %v1456_v62 = vld [vmem:[%s3233_s4 + $0x278] sm:$0xff] }
 0x224   :  { %2291 = vmatprep.subr.bf16.mxu1 %v2290_v9  ;;  %v2354_v56 = vpack.c.bf16 %v1456_v62, %v1455_v61 }
 0x227   :  { %2293 = vmatpush3.bf16.msra.mxu1 %v2290_v9  ;;  %v1177_v9 = vmul.f32 %v3002_v8, %v2874_v44  ;;  %v2393_v44 = vld [vmem:[%s3232_s0 + $0x8] sm:$0xff] }
 0x228   :  { %2295 = vmatprep.subr.bf16.mxu1 %v2294_v13 }
 0x22a   :  { %1957 = vmatmul.mubr.f32.vlgmr.msra.gmra.mrb[0].mxu1 %v940_v20 }
 0x22b   :  { %1959 = vmatprep.mubr.f32.mxu1 %v941_v22  ;;  %2297 = vmatpush3.bf16.msra.mxu1 %v2294_v13 }
 0x22c   :  { %2299 = vmatprep.subr.bf16.mxu1 %v2298_v21 }
 0x22e   :  { %1960 = vmatmul.mubr.f32.gmra.mrb[2].mxu1 %v942_v23 }
 0x22f   :  { %2301 = vmatpush3.bf16.msra.mxu1 %v2298_v21  ;;  %1994 = vmatprep.mubr.f32.mxu1 %v1057_v35 }
 0x230   :  { %2303 = vmatprep.subr.bf16.mxu1 %v2302_v18 }
 0x233   :  { %2305 = vmatpush3.bf16.msra.mxu1 %v2302_v18 }
 0x234   :  { %2307 = vmatprep.subr.bf16.mxu1 %v2306_v24 }
 0x237   :  { %2309 = vmatpush3.bf16.msra.mxu1 %v2306_v24 }
 0x238   :  { %2311 = vmatprep.subr.bf16.mxu1 %v2310_v36 }
 0x23b   :  { %2313 = vmatpush3.bf16.msra.mxu1 %v2310_v36 }
 0x23c   :  { %2315 = vmatprep.subr.bf16.mxu1 %v2314_v26 }
 0x23f   :  { %2317 = vmatpush3.bf16.msra.mxu1 %v2314_v26 }
 0x240   :  { %2319 = vmatprep.subr.bf16.mxu1 %v2318_v29 }
 0x243   :  { %2321 = vmatpush3.bf16.msra.mxu1 %v2318_v29 }
 0x244   :  { %2323 = vmatprep.subr.bf16.mxu1 %v2322_v38 }
 0x247   :  { %2325 = vmatpush3.bf16.msra.mxu1 %v2322_v38 }
 0x248   :  { %2327 = vmatprep.subr.bf16.mxu1 %v2326_v41 }
 0x24a   :  { %1995 = vmatmul.mubr.f32.vlgmr.msra.gmra.mrb[0].mxu1 %v1058_v49 }
 0x24b   :  { %1997 = vmatprep.mubr.f32.mxu1 %v1059_v54  ;;  %2329 = vmatpush3.bf16.msra.mxu1 %v2326_v41 }
 0x24c   :  { %2331 = vmatprep.subr.bf16.mxu1 %v2330_v51 }
 0x24e   :  { %1998 = vmatmul.mubr.f32.gmra.mrb[2].mxu1 %v1060_v32 }
 0x24f   :  { %2333 = vmatpush3.bf16.msra.mxu1 %v2330_v51  ;;  %2032 = vmatprep.mubr.f32.mxu1 %v1175_v55 }
 0x250   :  { %2335 = vmatprep.subr.bf16.mxu1 %v2334_v4 }
 0x253   :  { %2337 = vmatpush3.bf16.msra.mxu1 %v2334_v4 }
 0x254   :  { %2339 = vmatprep.subr.bf16.mxu1 %v2338_v53 }
 0x257   :  { %2341 = vmatpush3.bf16.msra.mxu1 %v2338_v53 }
 0x258   :  { %2343 = vmatprep.subr.bf16.mxu1 %v2342_v6 }
 0x25b   :  { %2345 = vmatpush3.bf16.msra.mxu1 %v2342_v6 }
 0x25c   :  { %2347 = vmatprep.subr.bf16.mxu1 %v2346_v58 }
 0x25f   :  { %2349 = vmatpush3.bf16.msra.mxu1 %v2346_v58 }
 0x260   :  { %2351 = vmatprep.subr.bf16.mxu1 %v2350_v60 }
 0x263   :  { %2353 = vmatpush3.bf16.msra.mxu1 %v2350_v60 }
 0x264   :  { %2355 = vmatprep.subr.bf16.mxu1 %v2354_v56 }
 0x267   :  { %2357 = vmatpush3.bf16.msra.mxu1 %v2354_v56 }
 0x26a   :  { %2033 = vmatmul.mubr.f32.vlgmr.msra.gmra.mrb[0].mxu1 %v1176_v0 }
 0x26b   :  { %2035 = vmatprep.mubr.f32.mxu1 %v1177_v9 }
 0x26e   :  { %2036 = vmatmul.mubr.f32.gmra.mrb[2].mxu1 %v1178_v10 }
 0x33d   :  { %v2034_v13 = vpop.f32.mrb[0].mxu1 }
 0x33e   :  { %v1293_v15 = vadd.f32 %v2034_v13, %v1457_v11  ;;  %v1262_v19 = vpop.f32.mrb[1].mxu1 }
 0x33f   :  { %v1292_v20 = vadd.f32 %v1457_v11, %v1262_v19 }
 0x340   :  { %v1297_v21 = vmax.f32 %v1293_v15, 0.0 }
 0x341   :  { %v1296_v22 = vmax.f32 %v1292_v20, 0.0  ;;  %v2037_v42 = vpop.f32.mrb[2].mxu1 }
 0x342   :  { %v1301_v12 = vadd.f32 %v2393_v44, %v1297_v21  ;;  %v1295_v8 = vadd.f32 %v2037_v42, %v1457_v11  ;;  %v1272_v45 = vpop.f32.mrb[3].mxu1 }
 0x343   :  { %v1300_v3 = vadd.f32 %v2394_v52, %v1296_v22  ;;  %v1294_v50 = vadd.f32 %v1457_v11, %v1272_v45 }
 0x344   :  { %v1305_v23 = vmax.f32 %v1301_v12, 0.0  ;;  %v1299_v18 = vmax.f32 %v1295_v8, 0.0 }
 0x345   :  { %v1304_v35 = vmax.f32 %v1300_v3, 0.0  ;;  %v1298_v16 = vmax.f32 %v1294_v50, 0.0 }
 0x346   :  { %1309 = vst [vmem:[%s3236_s6 + $0x8] sm:$0xff] %v1305_v23  ;;  %v1303_v24 = vadd.f32 %v2395_v63, %v1299_v18 }
 0x347   :  { %1308 = vst [vmem:[%s3236_s6] sm:$0xff] %v1304_v35  ;;  %v1302_v31 = vadd.f32 %v2396_v33, %v1298_v16 }
 0x348   :  { %v1307_v36 = vmax.f32 %v1303_v24, 0.0 }
 0x349   :  { %v1306_v2 = vmax.f32 %v1302_v31, 0.0 }
 0x34a   :  { %1311 = vst [vmem:[%s3236_s6 + $0x18] sm:$0xff] %v1307_v36 }
 0x34b   :  { %1310 = vst [vmem:[%s3236_s6 + $0x10] sm:$0xff] %v1306_v2 }

</bundles_post_ra>
